<compile_context>
chip_gen: v5e
topology: v5e:2x2
jax: 0.10.0
libtpu: 0.0.40
codegen_flags: <defaults>
</compile_context>

<pallas_src>
import jax
import jax.numpy as jnp
from jax.experimental import pallas as pl
from jax.experimental.pallas import tpu as pltpu

BETA_MIN = 0.1
BETA_MAX = 20.0
EPS = 1e-5

# Target per-input VMEM block size.  2 inputs x 2 pipeline buffers x 4 MiB
# = 16 MiB, comfortably inside the scoped-VMEM budget on v5e/v6e/v7x.
_TARGET_BLOCK_BYTES = 4 * 1024 * 1024


def _bss_partial_kernel(t_ref, x_ref, n_ref, w_ref, v_ref, out_ref):
    """One grid step == one batch tile of TB elements.

    t_ref  : (TB, C, 1) f32  random_t, replicated along channels
    x_ref  : (TB, C, L) f32  clean data tile
    n_ref  : (TB, C, L) f32  gaussian noise tile
    w_ref  : (C, C)     f32  stand-in score-net weight (resident across tiles)
    v_ref  : (C, 1)     f32  stand-in score-net time-conditioning vector
    out_ref: (1, C, L)  f32  lane-dense per-tile partial sums

    Writes partial[c,l] = sum_b std_b*score(xt_b)[c,l] + sum_b noise_b[c,l].
    """
    t = t_ref[...]                                        # (TB, C, 1)

    # Score_sch schedule, vectorised over the tile (tiny arrays, EUP/VPU).
    alpha = jnp.exp(-(BETA_MAX - BETA_MIN) * t * t * 0.5 - t * BETA_MIN)
    beta = 1.0 - alpha                                    # BETA(t) = std^2
    std = jnp.sqrt(beta)
    scale = jnp.sqrt(alpha)

    x = x_ref[...]                                        # (TB, C, L)
    n = n_ref[...]                                        # (TB, C, L)

    # y = sum_b std_b * xt_b  with  xt_b = scale_b*x_b + std_b*n_b  (disturb).
    # Pure VPU: per-batch weights are lane-broadcast, reduction is over the
    # leading (non-minor) dim — no cross-lane XLU work in the steady state.
    y = jnp.sum((scale * std) * x + beta * n, axis=0)     # (C, L)
    nsum = jnp.sum(n, axis=0)                             # (C, L)
    svt = jnp.sum(std * t, axis=0)                        # (C, 1) = sum_b std_b*t_b

    # Stand-in score net: one wide MXU matmul per tile.
    score_w = jnp.dot(w_ref[...], y, preferred_element_type=jnp.float32)  # (C, L)

    out_ref[0] = score_w + v_ref[...] * svt + nsum


@jax.jit
def bss_loss(data, random_t, noise, w, v):
    B, C, L = data.shape
    data = data.astype(jnp.float32)
    noise = noise.astype(jnp.float32)
    random_t = random_t.astype(jnp.float32)
    w = w.astype(jnp.float32)
    v = v.astype(jnp.float32)

    # Batch-tile size: biggest tile that keeps each input block ~4 MiB.
    row_bytes = C * L * 4
    tb = int(min(max(1, _TARGET_BLOCK_BYTES // row_bytes), B))
    num_tiles = pl.cdiv(B, tb)
    b_pad = num_tiles * tb
    if b_pad != B:
        pad = b_pad - B
        # Zero-padded rows (t=0 -> std=0, noise=0) contribute exactly 0 to the
        # partial sums; the eps term below uses the real B.
        data = jnp.pad(data, ((0, pad), (0, 0), (0, 0)))
        noise = jnp.pad(noise, ((0, pad), (0, 0), (0, 0)))
        random_t = jnp.pad(random_t, ((0, pad),))

    # Per-batch time replicated along channels so every in-kernel broadcast is
    # a plain lane broadcast ((TB, C, 1) -> (TB, C, L)).  Negligible bytes.
    t3 = jnp.broadcast_to(random_t[:, None, None], (b_pad, C, 1))

    grid_spec = pltpu.PrefetchScalarGridSpec(
        num_scalar_prefetch=0,
        grid=(num_tiles,),
        in_specs=[
            pl.BlockSpec((tb, C, 1), lambda i: (i, 0, 0)),   # t
            pl.BlockSpec((tb, C, L), lambda i: (i, 0, 0)),   # data
            pl.BlockSpec((tb, C, L), lambda i: (i, 0, 0)),   # noise
            pl.BlockSpec((C, C), lambda i: (0, 0)),          # W (stays resident)
            pl.BlockSpec((C, 1), lambda i: (0, 0)),          # v (stays resident)
        ],
        out_specs=pl.BlockSpec((1, C, L), lambda i: (i, 0, 0)),
    )

    partials = pl.pallas_call(
        _bss_partial_kernel,
        out_shape=jax.ShapeDtypeStruct((num_tiles, C, L), jnp.float32),
        grid_spec=grid_spec,
        compiler_params=pltpu.CompilerParams(
            dimension_semantics=("parallel",),   # no cross-tile carry
            vmem_limit_bytes=32 * 1024 * 1024,
        ),
    )(t3, data, noise, w, v)

    # Tiny epilogue in plain JAX: global sum of lane-dense partials, the
    # constant eps contribution, and the final square.
    total = jnp.sum(partials) + jnp.float32(EPS) * (B * C * L)
    return total * total


def _reference(data, random_t, noise, w, v):
    """Plain-JAX reference of the same math (per-batch, no algebraic fold)."""
    t = random_t[:, None, None]
    alpha = jnp.exp(-(BETA_MAX - BETA_MIN) * t * t * 0.5 - t * BETA_MIN)
    beta = 1.0 - alpha
    std = jnp.sqrt(beta)
    xt = jnp.sqrt(alpha) * data + std * noise
    score = jnp.einsum("cd,bdl->bcl", w, xt,
                       precision=jax.lax.Precision.HIGHEST) + v[None] * t
    total = jnp.sum(score * std + noise + EPS)
    return total * total


if __name__ == "__main__":
    B, C, L = 8, 8, 256  # small demo shapes; C mult of 8, L mult of 128

    key = jax.random.PRNGKey(0)
    k_data, k_t, k_noise, k_w, k_v = jax.random.split(key, 5)

    data = jax.random.normal(k_data, (B, C, L), dtype=jnp.float32)
    random_t = jax.random.uniform(k_t, (B,), dtype=jnp.float32)
    noise = jax.random.normal(k_noise, (B, C, L), dtype=jnp.float32)

    # Deterministic synthetic score-net parameters (stand-in for SSSD).
    w = jax.random.normal(k_w, (C, C), dtype=jnp.float32) * 0.1
    v = jax.random.normal(k_v, (C, 1), dtype=jnp.float32) * 0.1

    loss = jax.block_until_ready(bss_loss(data, random_t, noise, w, v))
    ref = _reference(data, random_t, noise, w, v)

    assert jnp.allclose(loss, ref, rtol=1e-3, atol=1e-2), (loss, ref)
    print("KERNEL_OK")
</pallas_src>

<mosaic_0001>
module attributes {stable_mosaic.version = 11 : i64} {
  func.func @_bss_partial_kernel(%arg0: i32, %arg1: memref<8x8x1xf32, #tpu.memory_space<vmem>>, %arg2: memref<8x8x256xf32, #tpu.memory_space<vmem>>, %arg3: memref<8x8x256xf32, #tpu.memory_space<vmem>>, %arg4: memref<8x8xf32, #tpu.memory_space<vmem>>, %arg5: memref<8x1xf32, #tpu.memory_space<vmem>>, %arg6: memref<1x8x256xf32, #tpu.memory_space<vmem>>) attributes {dimension_semantics = [#tpu.dimension_semantics<parallel>], iteration_bounds = array<i64: 1>, scalar_prefetch = 0 : i64, scratch_operands = 0 : i64, tpu.core_type = #tpu.core_type<tc>, window_params = [{transform_indices = @transform_0, window_bounds = array<i64: 8, 8, 1>}, {transform_indices = @transform_1, window_bounds = array<i64: 8, 8, 256>}, {transform_indices = @transform_2, window_bounds = array<i64: 8, 8, 256>}, {pipeline_mode = #tpu.pipeline_mode<synchronous>, transform_indices = @transform_3, window_bounds = array<i64: 8, 8>}, {pipeline_mode = #tpu.pipeline_mode<synchronous>, transform_indices = @transform_4, window_bounds = array<i64: 8, 1>}, {transform_indices = @transform_5, window_bounds = array<i64: 1, 8, 256>}]} {
    %c0 = arith.constant 0 : index
    %c0_0 = arith.constant 0 : index
    %c0_1 = arith.constant 0 : index
    %0 = vector.load %arg1[%c0, %c0_0, %c0_1] : memref<8x8x1xf32, #tpu.memory_space<vmem>>, vector<8x8x1xf32>
    %cst = arith.constant -1.990000e+01 : f32
    %1 = vector.broadcast %cst : f32 to vector<8x8x1xf32>
    %2 = arith.mulf %1, %0 : vector<8x8x1xf32>
    %3 = arith.mulf %2, %0 : vector<8x8x1xf32>
    %cst_2 = arith.constant 5.000000e-01 : f32
    %4 = vector.broadcast %cst_2 : f32 to vector<8x8x1xf32>
    %5 = arith.mulf %3, %4 : vector<8x8x1xf32>
    %cst_3 = arith.constant 1.000000e-01 : f32
    %6 = vector.broadcast %cst_3 : f32 to vector<8x8x1xf32>
    %7 = arith.mulf %0, %6 : vector<8x8x1xf32>
    %8 = arith.subf %5, %7 : vector<8x8x1xf32>
    %9 = math.exp %8 : vector<8x8x1xf32>
    %cst_4 = arith.constant 1.000000e+00 : f32
    %10 = vector.broadcast %cst_4 : f32 to vector<8x8x1xf32>
    %11 = arith.subf %10, %9 : vector<8x8x1xf32>
    %12 = math.sqrt %11 : vector<8x8x1xf32>
    %13 = math.sqrt %9 : vector<8x8x1xf32>
    %c0_5 = arith.constant 0 : index
    %c0_6 = arith.constant 0 : index
    %c0_7 = arith.constant 0 : index
    %14 = vector.load %arg2[%c0_5, %c0_6, %c0_7] : memref<8x8x256xf32, #tpu.memory_space<vmem>>, vector<8x8x256xf32>
    %c0_8 = arith.constant 0 : index
    %c0_9 = arith.constant 0 : index
    %c0_10 = arith.constant 0 : index
    %15 = vector.load %arg3[%c0_8, %c0_9, %c0_10] : memref<8x8x256xf32, #tpu.memory_space<vmem>>, vector<8x8x256xf32>
    %16 = arith.mulf %13, %12 : vector<8x8x1xf32>
    %17 = vector.broadcast %16 : vector<8x8x1xf32> to vector<8x8x256xf32>
    %18 = arith.mulf %17, %14 : vector<8x8x256xf32>
    %19 = vector.broadcast %11 : vector<8x8x1xf32> to vector<8x8x256xf32>
    %20 = arith.mulf %19, %15 : vector<8x8x256xf32>
    %21 = arith.addf %18, %20 : vector<8x8x256xf32>
    %cst_11 = arith.constant dense<0.000000e+00> : vector<8x256xf32>
    %22 = vector.multi_reduction <add>, %21, %cst_11 [0] : vector<8x8x256xf32> to vector<8x256xf32>
    %cst_12 = arith.constant dense<0.000000e+00> : vector<8x256xf32>
    %23 = vector.multi_reduction <add>, %15, %cst_12 [0] : vector<8x8x256xf32> to vector<8x256xf32>
    %24 = arith.mulf %12, %0 : vector<8x8x1xf32>
    %cst_13 = arith.constant dense<0.000000e+00> : vector<8x1xf32>
    %25 = vector.multi_reduction <add>, %24, %cst_13 [0] : vector<8x8x1xf32> to vector<8x1xf32>
    %c0_14 = arith.constant 0 : index
    %c0_15 = arith.constant 0 : index
    %26 = vector.load %arg4[%c0_14, %c0_15] : memref<8x8xf32, #tpu.memory_space<vmem>>, vector<8x8xf32>
    %cst_16 = arith.constant dense<0.000000e+00> : vector<8x256xf32>
    %27 = tpu.matmul %26, %22, %cst_16 {dimension_numbers = #tpu.dot_dimension_numbers<[1], [0], [0], [1], [0, 0, 1, 1], [], []>} : vector<8x8xf32>, vector<8x256xf32>, vector<8x256xf32> -> vector<8x256xf32>
    %c0_17 = arith.constant 0 : index
    %c0_18 = arith.constant 0 : index
    %28 = vector.load %arg5[%c0_17, %c0_18] : memref<8x1xf32, #tpu.memory_space<vmem>>, vector<8x1xf32>
    %29 = arith.mulf %28, %25 : vector<8x1xf32>
    %30 = vector.broadcast %29 : vector<8x1xf32> to vector<8x256xf32>
    %31 = arith.addf %27, %30 : vector<8x256xf32>
    %32 = arith.addf %31, %23 : vector<8x256xf32>
    %c0_19 = arith.constant 0 : index
    %c0_20 = arith.constant 0 : index
    %c0_21 = arith.constant 0 : index
    %33 = vector.load %arg6[%c0_19, %c0_20, %c0_21] : memref<1x8x256xf32, #tpu.memory_space<vmem>>, vector<1x8x256xf32>
    %34 = vector.shape_cast %33 : vector<1x8x256xf32> to vector<8x256xf32>
    %35 = vector.shape_cast %32 : vector<8x256xf32> to vector<1x8x256xf32>
    tpu.vector_store %arg6[%c0_19, %c0_20, %c0_21], %35 {strides = array<i32>} : memref<1x8x256xf32, #tpu.memory_space<vmem>>, vector<1x8x256xf32>,
    return
  }
  func.func @transform_0(%arg0: i32) -> (i32, i32, i32) {
    %c0_i32 = arith.constant 0 : i32
    %c0_i32_0 = arith.constant 0 : i32
    %c0_i32_1 = arith.constant 0 : i32
    return %arg0, %c0_i32, %c0_i32_0 : i32, i32, i32
  }
  func.func @transform_1(%arg0: i32) -> (i32, i32, i32) {
    %c0_i32 = arith.constant 0 : i32
    %c0_i32_0 = arith.constant 0 : i32
    %c0_i32_1 = arith.constant 0 : i32
    return %arg0, %c0_i32, %c0_i32_0 : i32, i32, i32
  }
  func.func @transform_2(%arg0: i32) -> (i32, i32, i32) {
    %c0_i32 = arith.constant 0 : i32
    %c0_i32_0 = arith.constant 0 : i32
    %c0_i32_1 = arith.constant 0 : i32
    return %arg0, %c0_i32, %c0_i32_0 : i32, i32, i32
  }
  func.func @transform_3(%arg0: i32) -> (i32, i32) {
    %c0_i32 = arith.constant 0 : i32
    %c0_i32_0 = arith.constant 0 : i32
    %c0_i32_1 = arith.constant 0 : i32
    return %c0_i32, %c0_i32_0 : i32, i32
  }
  func.func @transform_4(%arg0: i32) -> (i32, i32) {
    %c0_i32 = arith.constant 0 : i32
    %c0_i32_0 = arith.constant 0 : i32
    %c0_i32_1 = arith.constant 0 : i32
    return %c0_i32, %c0_i32_0 : i32, i32
  }
  func.func @transform_5(%arg0: i32) -> (i32, i32, i32) {
    %c0_i32 = arith.constant 0 : i32
    %c0_i32_0 = arith.constant 0 : i32
    %c0_i32_1 = arith.constant 0 : i32
    return %arg0, %c0_i32, %c0_i32_0 : i32, i32, i32
  }
}

</mosaic_0001>

<bundles_post_ra>
// kernel: bss_loss.1
= control target key start
LH: loop header
LB: loop body
LE: loop exit
PB: predicated region body
PF: predicated region fallthrough
CT: control target
= control target key end

     0   :  { %10 = vsyncpa [#allocation3], 0  ;;  %s1144_s0 = inlined_call_operand.vmem [shape: f32[8,8,1], index: 0, kind: input, shape index: {}]   ;;  %s1145_s1 = inlined_call_operand.hbm [shape: f32[8,8,256], index: 1, kind: input, shape index: {}]   ;;  %s1146_s2 = inlined_call_operand.hbm [shape: f32[8,8,256], index: 2, kind: input, shape index: {}]   ;;  %s1147_s3 = inlined_call_operand.vmem [shape: f32[8,8], index: 3, kind: input, shape index: {}]   ;;  %s1148_s4 = inlined_call_operand.vmem [shape: f32[8,1], index: 4, kind: input, shape index: {}]   ;;  %s1149_s5 = inlined_call_operand.vmem [shape: f32[1,8,256], index: 5, kind: output, shape index: {}]  }
   0x1   :  { %s18_s20 = sshll.u32 %s1145_s1, 4  ;;  %s19_s20 = int_to_ptr.hbm [resolvable:$true] %s18_s20 }
   0x2   :  { %11 = vsyncpa [#allocation5], 0  ;;  %s708_s21 = smov [#allocation2]   ;;  %s31_s25 = sshll.u32 %s1146_s2, 4  ;;  %s32_s25 = int_to_ptr.hbm [resolvable:$true] %s31_s25 }
   0x3   :  { %s20_s22 = sshll.u32 %s708_s21, 4  ;;  %s709_s26 = smov 256   ;;  %s21_s22 = int_to_ptr.vmem [resolvable:$true] %s20_s22 }
   0x4   :  { %s710_s27 = smov 16   ;;  %s711_s28 = smov [#allocation4]  }
   0x5   :  { %26 = dma.hbm_to_vmem [thread:$0]  %s19_s20, 2048, %s21_s22, [#allocation3], %s709_s26, %s709_s26, %s710_s27  }
   0x6   :  { %s33_s29 = sshll.u32 %s711_s28, 4  ;;  %s34_s29 = int_to_ptr.vmem [resolvable:$true] %s33_s29 }
   0x7   :  { %39 = dma.hbm_to_vmem [thread:$0]  %s32_s25, 2048, %s34_s29, [#allocation5], %s709_s26, %s709_s26, %s710_s27  }
   0x8   :  { %704 = dma.done.wait [#allocation3], 2048  }
   0x9   :  { %705 = vsyncadd [#allocation3], 4294965248 }
   0xa   :  { %706 = dma.done.wait [#allocation5], 2048  }
   0xb   :  { %707 = vsyncadd [#allocation5], 4294965248  ;;  %v712_v0 = vmov 0   ;;  %v752_v1 = vld [vmem:[%s1144_s0] sm:$0xff]  ;;  %v757_v2 = vld [vmem:[%s1144_s0 + $0x8] sm:$0xff]  ;;  %vm520_vm15 = vcmask 7168  }
   0xc   :  { %605 = vset.pattern.permute.xlu1 %v712_v0  ;;  %607 = vset.pattern.permute.xlu0 %v712_v0  ;;  %v762_v3 = vld [vmem:[%s1144_s0 + $0x20] sm:$0xff]  ;;  %v60_v4 = vmul.f32 -19.9, %v752_v1  ;;  %v61_v5 = vmul.f32 -19.9, %v757_v2  ;;  %v774_v11 = vld [vmem:[%s1144_s0 + $0x10] sm:$0xff] }
   0xd   :  { %606 = vset.pattern.permute.xlu2 %v712_v0  ;;  %v84_v6 = vmul.f32 0.1, %v752_v1  ;;  %v64_v7 = vmul.f32 -19.9, %v762_v3  ;;  %v85_v10 = vmul.f32 0.1, %v757_v2 }
   0xe   :  { %v68_v8 = vmul.f32 %v60_v4, %v752_v1  ;;  %v69_v9 = vmul.f32 %v61_v5, %v757_v2  ;;  %v779_v12 = vld [vmem:[%s1144_s0 + $0x18] sm:$0xff]  ;;  %v784_v13 = vld [vmem:[%s1144_s0 + $0x28] sm:$0xff]  ;;  %v88_v15 = vmul.f32 0.1, %v762_v3  ;;  %v62_v16 = vmul.f32 -19.9, %v774_v11 }
   0xf   :  { %v72_v14 = vmul.f32 %v64_v7, %v762_v3  ;;  %v63_v17 = vmul.f32 -19.9, %v779_v12  ;;  %v86_v20 = vmul.f32 0.1, %v774_v11  ;;  %v65_v21 = vmul.f32 -19.9, %v784_v13 }
  0x10   :  { %v76_v18 = vmul.f32 0.5, %v68_v8  ;;  %v77_v19 = vmul.f32 0.5, %v69_v9  ;;  %v70_v23 = vmul.f32 %v62_v16, %v774_v11  ;;  %v87_v25 = vmul.f32 0.1, %v779_v12  ;;  %v798_v26 = vld [vmem:[%s1144_s0 + $0x30] sm:$0xff]  ;;  %v816_v51 = vld [vmem:[%s1144_s0 + $0x38] sm:$0xff] }
  0x11   :  { %v80_v22 = vmul.f32 0.5, %v72_v14  ;;  %v71_v24 = vmul.f32 %v63_v17, %v779_v12  ;;  %v73_v29 = vmul.f32 %v65_v21, %v784_v13  ;;  %v89_v30 = vmul.f32 0.1, %v784_v13 }
  0x12   :  { %v92_v27 = vsub.f32 %v76_v18, %v84_v6  ;;  %v93_v28 = vsub.f32 %v77_v19, %v85_v10  ;;  %v78_v32 = vmul.f32 0.5, %v70_v23  ;;  %v66_v34 = vmul.f32 -19.9, %v798_v26 }
  0x13   :  { %v96_v31 = vsub.f32 %v80_v22, %v88_v15  ;;  %v79_v33 = vmul.f32 0.5, %v71_v24  ;;  %v81_v37 = vmul.f32 0.5, %v73_v29  ;;  %v90_v47 = vmul.f32 0.1, %v798_v26 }
  0x14   :  { %v100_v35 = vmul.f32 1.442695, %v92_v27  ;;  %v102_v36 = vmul.f32 1.442695, %v93_v28  ;;  %v94_v39 = vsub.f32 %v78_v32, %v86_v20  ;;  %v74_v43 = vmul.f32 %v66_v34, %v798_v26 }
  0x15   :  { %v108_v38 = vmul.f32 1.442695, %v96_v31  ;;  %v95_v40 = vsub.f32 %v79_v33, %v87_v25  ;;  %v97_v41 = vsub.f32 %v81_v37, %v89_v30  ;;  %v67_v58 = vmul.f32 -19.9, %v816_v51 }
  0x16   :  { %608 = vpow2.f32 %v100_v35  ;;  %v104_v42 = vmul.f32 1.442695, %v94_v39  ;;  %v82_v46 = vmul.f32 0.5, %v74_v43  ;;  %v849_v0 = vmul.f32 0.1, %v816_v51 }
  0x17   :  { %610 = vpow2.f32 %v102_v36  ;;  %v106_v44 = vmul.f32 1.442695, %v95_v40  ;;  %v110_v45 = vmul.f32 1.442695, %v97_v41  ;;  %v857_v7 = vmul.f32 %v67_v58, %v816_v51 }
  0x18   :  { %612 = vpow2.f32 %v108_v38  ;;  %v98_v56 = vsub.f32 %v82_v46, %v90_v47 }
  0x19   :  { %614 = vpow2.f32 %v104_v42 }
  0x1a   :  { %616 = vpow2.f32 %v110_v45  ;;  %v112_v63 = vmul.f32 1.442695, %v98_v56 }
  0x1b   :  { %618 = vpow2.f32 %v106_v44 }
  0x1c   :  { %v805_v48 = vpop.eup %608 }
  0x1d   :  { %v807_v49 = vpop.eup %610  ;;  %v810_v50 = vsub.f32 1.0, %v805_v48  ;;  %620 = vrsqrt.f32 %v805_v48  ;;  %v230_v6 = vand.u32 2147483648, %v805_v48  ;;  %vm227_vm0 = vcmp.eq.f32.partialorder %v805_v48, inf }
  0x1e   :  { %v818_v52 = vpop.eup %612  ;;  %v821_v53 = vsub.f32 1.0, %v807_v49  ;;  %622 = vrsqrt.f32 %v807_v49  ;;  %vm229_vm1 = vcmp.eq.f32.partialorder %v805_v48, 0.0  ;;  %v242_v34 = vand.u32 2147483648, %v807_v49 }
  0x1f   :  { %v824_v54 = vpop.eup %614  ;;  %414 = vperm.xlu1 %605, %v810_v50   ;;  %v828_v55 = vsub.f32 1.0, %v818_v52  ;;  %624 = vrsqrt.f32 %v810_v50  ;;  %v134_v10 = vand.u32 2147483648, %v810_v50  ;;  %vm131_vm2 = vcmp.eq.f32.partialorder %v810_v50, inf }
  0x20   :  { %v832_v57 = vsub.f32 1.0, %v824_v54  ;;  %626 = vrsqrt.f32 %v824_v54  ;;  %v836_v59 = vpop.eup %616  ;;  %v254_v15 = vand.u32 2147483648, %v824_v54  ;;  %v146_v24 = vand.u32 2147483648, %v821_v53 }
  0x21   :  { %434 = vperm.xlu0 %607, %v828_v55   ;;  %628 = vrsqrt.f32 %v821_v53  ;;  %v840_v60 = vpop.eup %618  ;;  %v844_v61 = vsub.f32 1.0, %v836_v59  ;;  %v290_v14 = vand.u32 2147483648, %v836_v59  ;;  %vm133_vm3 = vcmp.eq.f32.partialorder %v810_v50, 0.0 }
  0x22   :  { %424 = vperm.xlu2 %606, %v832_v57   ;;  %630 = vrsqrt.f32 %v836_v59  ;;  %v860_v9 = vsub.f32 1.0, %v840_v60  ;;  %v158_v22 = vand.u32 2147483648, %v832_v57  ;;  %vm251_vm4 = vcmp.eq.f32.partialorder %v824_v54, inf }
  0x23   :  { %v621_v62 = vpop.eup %620  ;;  %632 = vrsqrt.f32 %v832_v57  ;;  %v194_v19 = vand.u32 2147483648, %v844_v61  ;;  %vm253_vm5 = vcmp.eq.f32.partialorder %v824_v54, 0.0  ;;  %vm287_vm6 = vcmp.eq.f32.partialorder %v836_v59, inf }
  0x24   :  { %v851_v4 = vpop.eup %622  ;;  %v221_v5 = vmul.f32 %v621_v62, %v805_v48  ;;  %634 = vrsqrt.f32 %v844_v61  ;;  %vm143_vm7 = vcmp.eq.f32.partialorder %v821_v53, inf  ;;  %vm239_vm8 = vcmp.eq.f32.partialorder %v807_v49, inf }
  0x25   :  { %v625_v8 = vpop.eup %624  ;;  %v233_v20 = vmul.f32 %v851_v4, %v807_v49  ;;  %636 = vpow2.f32 %v112_v63  ;;  %vm289_vm9 = vcmp.eq.f32.partialorder %v836_v59, 0.0  ;;  %vm145_vm11 = vcmp.eq.f32.partialorder %v821_v53, 0.0 }
  0x26   :  { %v866_v16 = vpop.eup %626  ;;  %v125_v17 = vmul.f32 %v625_v8, %v810_v50  ;;  %v222_v18 = vmul.f32 %v621_v62, %v221_v5  ;;  %638 = vrsqrt.f32 %v828_v55  ;;  %vm191_vm12 = vcmp.eq.f32.partialorder %v844_v61, inf }
  0x27   :  { %v873_v21 = vpop.eup %628  ;;  %419 = vperm.xlu1 %605, %v821_v53   ;;  %v245_v23 = vmul.f32 %v866_v16, %v824_v54  ;;  %v234_v30 = vmul.f32 %v851_v4, %v233_v20  ;;  %vm157_vm13 = vcmp.eq.f32.partialorder %v832_v57, 0.0  ;;  %vm241_vm14 = vcmp.eq.f32.partialorder %v807_v49, 0.0 }
  0x28   :  { %v631_v25 = vpop.eup %630  ;;  %v126_v27 = vmul.f32 %v625_v8, %v125_v17  ;;  %v223_v28 = vmul.f32 0.5, %v222_v18  ;;  %v137_v29 = vmul.f32 %v873_v21, %v821_v53  ;;  %vm193_vm10 = vcmp.eq.f32.partialorder %v844_v61, 0.0 }
  0x29   :  { %v633_v31 = vpop.eup %632  ;;  %v281_v32 = vmul.f32 %v631_v25, %v836_v59  ;;  %v246_v33 = vmul.f32 %v866_v16, %v245_v23  ;;  %v235_v43 = vmul.f32 0.5, %v234_v30  ;;  %640 = vrsqrt.f32 %v818_v52 }
  0x2a   :  { %v635_v35 = vpop.eup %634  ;;  %439 = vperm.xlu2 %606, %v844_v61   ;;  %v127_v36 = vmul.f32 0.5, %v126_v27  ;;  %v224_v37 = vsub.f32 1.5, %v223_v28  ;;  %v149_v38 = vmul.f32 %v633_v31, %v832_v57  ;;  %v138_v39 = vmul.f32 %v873_v21, %v137_v29 }
  0x2b   :  { %v185_v40 = vmul.f32 %v635_v35, %v844_v61  ;;  %v282_v41 = vmul.f32 %v631_v25, %v281_v32  ;;  %v247_v42 = vmul.f32 0.5, %v246_v33  ;;  %v904_v56 = vpop.eup %636  ;;  %v236_v17 = vsub.f32 1.5, %v235_v43 }
  0x2c   :  { %v128_v44 = vsub.f32 1.5, %v127_v36  ;;  %v225_v45 = vmul.f32 %v621_v62, %v224_v37  ;;  %v150_v46 = vmul.f32 %v633_v31, %v149_v38  ;;  %v139_v47 = vmul.f32 0.5, %v138_v39  ;;  %v908_v27 = vpop.eup %638 }
  0x2d   :  { %v186_v58 = vmul.f32 %v635_v35, %v185_v40  ;;  %v283_v63 = vmul.f32 0.5, %v282_v41  ;;  %v248_v5 = vsub.f32 1.5, %v247_v42  ;;  %v237_v32 = vmul.f32 %v851_v4, %v236_v17 }
  0x2e   :  { %v129_v18 = vmul.f32 %v625_v8, %v128_v44  ;;  %v226_v62 = vmul.f32 %v805_v48, %v225_v45  ;;  %v151_v20 = vmul.f32 0.5, %v150_v46  ;;  %v140_v23 = vsub.f32 1.5, %v139_v47 }
  0x2f   :  { %429 = vperm.xlu1 %605, %v860_v9   ;;  %v187_v28 = vmul.f32 0.5, %v186_v58  ;;  %v284_v29 = vsub.f32 1.5, %v283_v63  ;;  %v249_v30 = vmul.f32 %v866_v16, %v248_v5  ;;  %v238_v43 = vmul.f32 %v807_v49, %v237_v32 }
  0x30   :  { %v130_v33 = vmul.f32 %v129_v18, %v810_v50  ;;  %v228_v8 = vsel %vm227_vm0, %v805_v48, %v226_v62  ;;  %v152_v36 = vsub.f32 1.5, %v151_v20  ;;  %v141_v37 = vmul.f32 %v873_v21, %v140_v23 }
  0x31   :  { %v231_v38 = vsel %vm229_vm1, %v230_v6, %v228_v8  ;;  %v188_v39 = vsub.f32 1.5, %v187_v28  ;;  %v285_v40 = vmul.f32 %v631_v25, %v284_v29  ;;  %v250_v16 = vmul.f32 %v824_v54, %v249_v30  ;;  %v641_v29 = vpop.eup %640 }
  0x32   :  { %v132_v4 = vsel %vm131_vm2, %v810_v50, %v130_v33  ;;  %v153_v41 = vmul.f32 %v633_v31, %v152_v36  ;;  %v142_v42 = vmul.f32 %v141_v37, %v821_v53  ;;  %vm1150_vm0 = vcmp.eq.f32.partialorder %v832_v57, inf }
  0x33   :  { %v135_v21 = vsel %vm133_vm3, %v134_v10, %v132_v4  ;;  %v189_v48 = vmul.f32 %v635_v35, %v188_v39  ;;  %v286_v6 = vmul.f32 %v836_v59, %v285_v40  ;;  %v252_v25 = vsel %vm251_vm4, %v824_v54, %v250_v16 }
  0x34   :  { %v348_v44 = vmul.f32 %v231_v38, %v135_v21  ;;  %v512_v45 = vmul.f32 %v135_v21, %v752_v1  ;;  %v154_v31 = vmul.f32 %v153_v41, %v832_v57  ;;  %v255_v46 = vsel %vm253_vm5, %v254_v15, %v252_v25 }
  0x35   :  { %v190_v50 = vmul.f32 %v189_v48, %v844_v61  ;;  %v288_v10 = vsel %vm287_vm6, %v836_v59, %v286_v6  ;;  %v144_v35 = vsel %vm143_vm7, %v821_v53, %v142_v42  ;;  %v240_v1 = vsel %vm239_vm8, %v807_v49, %v238_v43 }
  0x36   :  { %358 = vperm.xlu0 %607, %v348_v44   ;;  %v291_v54 = vsel %vm289_vm9, %v290_v14, %v288_v10  ;;  %v156_v15 = vsel %vm1150_vm0, %v832_v57, %v154_v31  ;;  %v147_v47 = vsel %vm145_vm11, %v146_v24, %v144_v35  ;;  %v83_v58 = vmul.f32 0.5, %v857_v7 }
  0x37   :  { %v192_v63 = vsel %vm191_vm12, %v844_v61, %v190_v50  ;;  %v159_v59 = vsel %vm157_vm13, %v158_v22, %v156_v15  ;;  %v243_v14 = vsel %vm241_vm14, %v242_v34, %v240_v1  ;;  %v513_v5 = vmul.f32 %v147_v47, %v757_v2 }
  0x38   :  { %v521_v53 = vsel %vm520_vm15, %v512_v45, 0.0  ;;  %v195_v7 = vsel %vm193_vm10, %v194_v19, %v192_v63  ;;  %v350_v24 = vmul.f32 %v255_v46, %v159_v59  ;;  %v514_v17 = vmul.f32 %v159_v59, %v774_v11 }
  0x39   :  { %v353_v18 = vmul.f32 %v291_v54, %v195_v7  ;;  %v522_v57 = vsel %vm520_vm15, %v513_v5, 0.0  ;;  %v349_v22 = vmul.f32 %v243_v14, %v147_v47  ;;  %v173_v49 = vmul.f32 %v908_v27, %v828_v55 }
  0x3a   :  { %368 = vperm.xlu2 %606, %v350_v24   ;;  %v523_v2 = vadd.f32 %v522_v57, %v521_v53  ;;  %v986_v34 = vsub.f32 1.0, %v904_v56  ;;  %v99_v61 = vsub.f32 %v83_v58, %v849_v0  ;;  %v524_v19 = vsel %vm520_vm15, %v514_v17, 0.0 }
  0x3b   :  { %383 = vperm.xlu1 %605, %v353_v18   ;;  %v174_v11 = vmul.f32 %v908_v27, %v173_v49  ;;  %642 = vrsqrt.f32 %v860_v9  ;;  %v269_v32 = vmul.f32 %v641_v29, %v818_v52  ;;  %v1001_v8 = vmul.f32 %v195_v7, %v784_v13 }
  0x3c   :  { %644 = vrsqrt.f32 %v840_v60  ;;  %v994_v20 = vadd.f32 %v524_v19, %v523_v2  ;;  %v114_v23 = vmul.f32 1.442695, %v99_v61  ;;  %vm179_vm1 = vcmp.eq.f32.partialorder %v828_v55, inf }
  0x3d   :  { %v175_v62 = vmul.f32 0.5, %v174_v11  ;;  %646 = vrsqrt.f32 %v986_v34  ;;  %vm181_vm2 = vcmp.eq.f32.partialorder %v828_v55, 0.0  ;;  %v270_v38 = vmul.f32 %v641_v29, %v269_v32 }
  0x3e   :  { %363 = vperm.xlu0 %607, %v349_v22   ;;  %648 = vrsqrt.f32 %v904_v56  ;;  %v182_v40 = vand.u32 2147483648, %v828_v55  ;;  %vm275_vm3 = vcmp.eq.f32.partialorder %v818_v52, inf  ;;  %vm277_vm4 = vcmp.eq.f32.partialorder %v818_v52, 0.0 }
  0x3f   :  { %v176_v28 = vsub.f32 1.5, %v175_v62  ;;  %650 = vpow2.f32 %v114_v23  ;;  %v271_v4 = vmul.f32 0.5, %v270_v38  ;;  %v278_v41 = vand.u32 2147483648, %v818_v52 }
  0x40   :  { %vm167_vm5 = vcmp.eq.f32.partialorder %v860_v9, inf  ;;  %vm169_vm6 = vcmp.eq.f32.partialorder %v860_v9, 0.0  ;;  %v170_v6 = vand.u32 2147483648, %v860_v9  ;;  %vm263_vm7 = vcmp.eq.f32.partialorder %v840_v60, inf }
  0x41   :  { %v643_v0 = vpop.eup %642  ;;  %v177_v30 = vmul.f32 %v908_v27, %v176_v28  ;;  %v272_v44 = vsub.f32 1.5, %v271_v4  ;;  %vm265_vm8 = vcmp.eq.f32.partialorder %v840_v60, 0.0  ;;  %v266_v59 = vand.u32 2147483648, %v840_v60 }
  0x42   :  { %v645_v33 = vpop.eup %644  ;;  %v161_v36 = vmul.f32 %v643_v0, %v860_v9  ;;  %vm203_vm9 = vcmp.eq.f32.partialorder %v986_v34, inf  ;;  %vm205_vm10 = vcmp.eq.f32.partialorder %v986_v34, 0.0  ;;  %v206_v17 = vand.u32 2147483648, %v986_v34 }
  0x43   :  { %444 = vperm.xlu1 %605, %v986_v34   ;;  %v178_v37 = vmul.f32 %v177_v30, %v828_v55  ;;  %v257_v39 = vmul.f32 %v645_v33, %v840_v60  ;;  %v647_v27 = vpop.eup %646  ;;  %v273_v35 = vmul.f32 %v641_v29, %v272_v44  ;;  %vm299_vm11 = vcmp.eq.f32.partialorder %v904_v56, inf }
  0x44   :  { %v162_v13 = vmul.f32 %v643_v0, %v161_v36  ;;  %v1012_v16 = vpop.eup %648  ;;  %v197_v43 = vmul.f32 %v647_v27, %v986_v34  ;;  %vm301_vm12 = vcmp.eq.f32.partialorder %v904_v56, 0.0 }
  0x45   :  { %v258_v42 = vmul.f32 %v645_v33, %v257_v39  ;;  %v1016_v21 = vpop.eup %650  ;;  %v180_v25 = vsel %vm179_vm1, %v828_v55, %v178_v37  ;;  %v293_v10 = vmul.f32 %v1012_v16, %v904_v56  ;;  %v274_v58 = vmul.f32 %v818_v52, %v273_v35 }
  0x46   :  { %v163_v48 = vmul.f32 0.5, %v162_v13  ;;  %v1025_v31 = vsub.f32 1.0, %v1016_v21  ;;  %v198_v50 = vmul.f32 %v647_v27, %v197_v43  ;;  %652 = vrsqrt.f32 %v1016_v21 }
  0x47   :  { %v259_v45 = vmul.f32 0.5, %v258_v42  ;;  %v183_v54 = vsel %vm181_vm2, %v182_v40, %v180_v25  ;;  %v294_v53 = vmul.f32 %v1012_v16, %v293_v10  ;;  %v276_v55 = vsel %vm275_vm3, %v818_v52, %v274_v58 }
  0x48   :  { %v164_v46 = vsub.f32 1.5, %v163_v48  ;;  %654 = vrsqrt.f32 %v1025_v31  ;;  %v199_v47 = vmul.f32 0.5, %v198_v50  ;;  %v516_v7 = vmul.f32 %v183_v54, %v762_v3 }
  0x49   :  { %v260_v1 = vsub.f32 1.5, %v259_v45  ;;  %v279_v57 = vsel %vm277_vm4, %v278_v41, %v276_v55  ;;  %v295_v2 = vmul.f32 0.5, %v294_v53  ;;  %v302_v13 = vand.u32 2147483648, %v904_v56  ;;  %v334_v53 = vld [vmem:[#allocation4 + $0x10] sm:$0xff]  ;;  %v335_v55 = vld [vmem:[#allocation4 + $0x18] sm:$0xff] }
  0x4a   :  { %v165_v15 = vmul.f32 %v643_v0, %v164_v46  ;;  %v200_v5 = vsub.f32 1.5, %v199_v47  ;;  %v352_v19 = vmul.f32 %v279_v57, %v183_v54  ;;  %v528_v32 = vsel %vm520_vm15, %v516_v7, 0.0 }
  0x4b   :  { %v261_v63 = vmul.f32 %v645_v33, %v260_v1  ;;  %vm311_vm13 = vcmp.eq.f32.partialorder %v1016_v21, inf  ;;  %vm215_vm14 = vcmp.eq.f32.partialorder %v1025_v31, inf  ;;  %v218_v44 = vand.u32 2147483648, %v1025_v31 }
  0x4c   :  { %v166_v14 = vmul.f32 %v165_v15, %v860_v9  ;;  %v653_v18 = vpop.eup %652  ;;  %v201_v49 = vmul.f32 %v647_v27, %v200_v5  ;;  %378 = vperm.xlu2 %606, %v352_v19   ;;  %v530_v27 = vsel %vm520_vm15, %v1001_v8, 0.0  ;;  %vm313_vm0 = vcmp.eq.f32.partialorder %v1016_v21, 0.0  ;;  %v333_v5 = vld [vmem:[#allocation4 + $0x8] sm:$0xff]  ;;  %v1097_v19 = vld [vmem:[#allocation4 + $0x40] sm:$0xff] }
  0x4d   :  { %v262_v24 = vmul.f32 %v840_v60, %v261_v63  ;;  %v305_v62 = vmul.f32 %v653_v18, %v1016_v21  ;;  %vm217_vm1 = vcmp.eq.f32.partialorder %v1025_v31, 0.0  ;;  %v537_v63 = vld [vmem:[%s1148_s4] sm:$0xff] }
  0x4e   :  { %v168_v22 = vsel %vm167_vm5, %v860_v9, %v166_v14  ;;  %v655_v61 = vpop.eup %654  ;;  %v202_v28 = vmul.f32 %v201_v49, %v986_v34  ;;  %v296_v9 = vsub.f32 1.5, %v295_v2  ;;  %v339_v49 = vld [vmem:[#allocation4 + $0x38] sm:$0xff] }
  0x4f   :  { %v171_v11 = vsel %vm169_vm6, %v170_v6, %v168_v22  ;;  %v264_v3 = vsel %vm263_vm7, %v840_v60, %v262_v24  ;;  %v209_v29 = vmul.f32 %v655_v61, %v1025_v31  ;;  %v306_v30 = vmul.f32 %v653_v18, %v305_v62  ;;  %v338_v22 = vld [vmem:[#allocation4 + $0x30] sm:$0xff] }
  0x50   :  { %v267_v52 = vsel %vm265_vm8, %v266_v59, %v264_v3  ;;  %v515_v23 = vmul.f32 %v171_v11, %v779_v12  ;;  %v204_v36 = vsel %vm203_vm9, %v986_v34, %v202_v28  ;;  %v297_v39 = vmul.f32 %v1012_v16, %v296_v9  ;;  %v1103_v62 = vld [vmem:[#allocation4 + $0x50] sm:$0xff] }
  0x51   :  { %v351_v0 = vmul.f32 %v267_v52, %v171_v11  ;;  %v210_v60 = vmul.f32 %v655_v61, %v209_v29  ;;  %v207_v12 = vsel %vm205_vm10, %v206_v17, %v204_v36  ;;  %v307_v38 = vmul.f32 0.5, %v306_v30  ;;  %v337_v17 = vld [vmem:[#allocation4 + $0x28] sm:$0xff]  ;;  %v1105_v52 = vld [vmem:[#allocation4 + $0x58] sm:$0xff]  ;;  %v1109_v29 = vld [vmem:[#allocation4 + $0x60] sm:$0xff] }
  0x52   :  { %v526_v33 = vsel %vm520_vm15, %v515_v23, 0.0  ;;  %v298_v42 = vmul.f32 %v904_v56, %v297_v39  ;;  %v518_v34 = vmul.f32 %v207_v12, %v798_v26  ;;  %v314_v6 = vand.u32 2147483648, %v1016_v21  ;;  %v1099_v11 = vld [vmem:[#allocation4 + $0x48] sm:$0xff]  ;;  %v1117_v39 = vld [vmem:[#allocation4 + $0x78] sm:$0xff] }
  0x53   :  { %v527_v37 = vadd.f32 %v526_v33, %v994_v20  ;;  %373 = vperm.xlu0 %607, %v351_v0   ;;  %v211_v40 = vmul.f32 0.5, %v210_v60  ;;  %v308_v41 = vsub.f32 1.5, %v307_v38  ;;  %v505_v24 = vadd.f32 %v335_v55, %v333_v5  ;;  %v1111_v0 = vld [vmem:[#allocation4 + $0x68] sm:$0xff]  ;;  %v1115_v38 = vld [vmem:[#allocation4 + $0x70] sm:$0xff] }
  0x54   :  { %v300_v8 = vsel %vm299_vm11, %v904_v56, %v298_v42  ;;  %v532_v50 = vsel %vm520_vm15, %v518_v34, 0.0  ;;  %v319_v42 = vld [vmem:[#allocation2 + $0x18] sm:$0xff]  ;;  %v316_v34 = vld [vmem:[#allocation2] sm:$0xff] }
  0x55   :  { %v529_v4 = vadd.f32 %v528_v32, %v527_v37  ;;  %v212_v20 = vsub.f32 1.5, %v211_v40  ;;  %v309_v48 = vmul.f32 %v653_v18, %v308_v41  ;;  %v303_v25 = vsel %vm301_vm12, %v302_v13, %v300_v8  ;;  %v318_v41 = vld [vmem:[#allocation2 + $0x10] sm:$0xff] }
  0x56   :  { %v354_v46 = vmul.f32 %v303_v25, %v207_v12  ;;  %v506_v57 = vadd.f32 %v505_v24, %v337_v17 }
  0x57   :  { %v531_v43 = vadd.f32 %v530_v27, %v529_v4  ;;  %v213_v16 = vmul.f32 %v655_v61, %v212_v20  ;;  %v310_v45 = vmul.f32 %v1016_v21, %v309_v48 }
  0x58   :  { %v507_v61 = vadd.f32 %v506_v57, %v339_v49 }
  0x59   :  { %v214_v26 = vmul.f32 %v213_v16, %v1025_v31  ;;  %v312_v56 = vsel %vm311_vm13, %v1016_v21, %v310_v45  ;;  %v533_v54 = vadd.f32 %v532_v50, %v531_v43  ;;  %v332_v21 = vld [vmem:[#allocation4] sm:$0xff]  ;;  %v317_v43 = vld [vmem:[#allocation2 + $0x8] sm:$0xff]  ;;  %v323_v50 = vld [vmem:[#allocation2 + $0x38] sm:$0xff] }
  0x5a   :  { %v315_v35 = vsel %vm313_vm0, %v314_v6, %v312_v56  ;;  %v498_v7 = vadd.f32 %v334_v53, %v332_v21  ;;  %v508_v3 = vadd.f32 %v507_v61, %v1099_v11  ;;  %v320_v16 = vld [vmem:[#allocation2 + $0x20] sm:$0xff]  ;;  %v321_v6 = vld [vmem:[#allocation2 + $0x28] sm:$0xff] }
  0x5b   :  { %388 = vperm.xlu0 %607, %v354_v46   ;;  %v216_v10 = vsel %vm215_vm14, %v1025_v31, %v214_v26  ;;  %v322_v26 = vld [vmem:[#allocation2 + $0x30] sm:$0xff] }
  0x5c   :  { %v219_v1 = vsel %vm217_vm1, %v218_v44, %v216_v10  ;;  %v509_v28 = vadd.f32 %v508_v3, %v1105_v52 }
  0x5d   :  { %v519_v15 = vmul.f32 %v219_v1, %v816_v51  ;;  %v355_v47 = vmul.f32 %v315_v35, %v219_v1  ;;  %v336_v51 = vld [vmem:[#allocation4 + $0x20] sm:$0xff] }
  0x5e   :  { %v499_v18 = vadd.f32 %v498_v7, %v336_v51  ;;  %v510_v9 = vadd.f32 %v509_v28, %v1111_v0 }
  0x5f   :  { %v534_v58 = vsel %vm520_vm15, %v519_v15, 0.0  ;;  %393 = vperm.xlu2 %606, %v355_v47   ;;  %vm544_vm15 = vcmask 64512  }
  0x60   :  { %v535_v59 = vadd.f32 %v534_v58, %v533_v54  ;;  %v500_v2 = vadd.f32 %v499_v18, %v338_v22  ;;  %v1123_v40 = vadd.f32 %v510_v9, %v1117_v39 }
  0x62   :  { %v538_v14 = vmul.f32 %v537_v63, %v535_v59 }
  0x63   :  { %449 = vperm.xlu0 %607, %v1025_v31   ;;  %v501_v31 = vadd.f32 %v500_v2, %v1097_v19 }
  0x64   :  { %541 = vperm.xlu1 %605, %v538_v14  }
  0x65   :  { %v502_v23 = vadd.f32 %v501_v31, %v1103_v62  ;;  %v324_v31 = vld [vmem:[#allocation2 + $0x40] sm:$0xff] }
  0x67   :  { %v503_v30 = vadd.f32 %v502_v23, %v1109_v29 }
  0x69   :  { %v1120_v27 = vadd.f32 %v503_v30, %v1115_v38 }
  0x7c   :  { %v425_v36 = vpop.permute.xlu2 %424 }
  0x7d   :  { %v456_v54 = vmul.f32 %v425_v36, %v336_v51  ;;  %v457_v15 = vmul.f32 %v425_v36, %v337_v17  ;;  %v327_v36 = vld [vmem:[#allocation2 + $0x58] sm:$0xff] }
  0x84   :  { %v440_v12 = vpop.permute.xlu2 %439 }
  0x91   :  { %v415_v32 = vpop.permute.xlu1 %414 }
  0x92   :  { %v452_v56 = vmul.f32 %v415_v32, %v332_v21  ;;  %v453_v10 = vmul.f32 %v415_v32, %v333_v5  ;;  %v325_v21 = vld [vmem:[#allocation2 + $0x48] sm:$0xff]  ;;  %v326_v32 = vld [vmem:[#allocation2 + $0x50] sm:$0xff] }
  0x93   :  { %v435_v33 = vpop.permute.xlu0 %434 }
  0x94   :  { %v369_v20 = vpop.permute.xlu2 %368  ;;  %v460_v17 = vmul.f32 %v435_v33, %v1097_v19  ;;  %v461_v28 = vmul.f32 %v435_v33, %v1099_v11 }
  0x95   :  { %v400_v47 = vmul.f32 %v369_v20, %v320_v16  ;;  %v401_v58 = vmul.f32 %v369_v20, %v321_v6  ;;  %v463_v20 = vmul.f32 %v440_v12, %v1105_v52  ;;  %v330_v16 = vld [vmem:[#allocation2 + $0x70] sm:$0xff]  ;;  %v331_v6 = vld [vmem:[#allocation2 + $0x78] sm:$0xff] }
  0x97   :  { %v472_v5 = vadd.f32 %v456_v54, %v400_v47  ;;  %v473_v3 = vadd.f32 %v457_v15, %v401_v58 }
  0x99   :  { %v420_v60 = vpop.permute.xlu1 %419 }
  0x9a   :  { %v454_v25 = vmul.f32 %v420_v60, %v334_v53  ;;  %v455_v44 = vmul.f32 %v420_v60, %v335_v55 }
  0xa1   :  { %v430_v13 = vpop.permute.xlu1 %429 }
  0xa2   :  { %v458_v55 = vmul.f32 %v430_v13, %v338_v22  ;;  %v459_v57 = vmul.f32 %v430_v13, %v339_v49  ;;  %v328_v22 = vld [vmem:[#allocation2 + $0x60] sm:$0xff]  ;;  %v329_v49 = vld [vmem:[#allocation2 + $0x68] sm:$0xff] }
  0xa6   :  { %v379_v53 = vpop.permute.xlu2 %378 }
  0xa7   :  { %v404_v30 = vmul.f32 %v379_v53, %v324_v31  ;;  %v405_v9 = vmul.f32 %v379_v53, %v325_v21 }
  0xa8   :  { %v359_v37 = vpop.permute.xlu0 %358 }
  0xa9   :  { %v396_v45 = vmul.f32 %v359_v37, %v316_v34  ;;  %v397_v46 = vmul.f32 %v359_v37, %v317_v43  ;;  %v477_v11 = vadd.f32 %v461_v28, %v405_v9 }
  0xab   :  { %v468_v14 = vadd.f32 %v452_v56, %v396_v45  ;;  %v469_v7 = vadd.f32 %v453_v10, %v397_v46 }
  0xad   :  { %v384_v63 = vpop.permute.xlu1 %383 }
  0xae   :  { %v406_v34 = vmul.f32 %v384_v63, %v326_v32  ;;  %v407_v43 = vmul.f32 %v384_v63, %v327_v36 }
  0xb0   :  { %v364_v4 = vpop.permute.xlu0 %363 }
  0xb1   :  { %v398_v48 = vmul.f32 %v364_v4, %v318_v41  ;;  %v399_v8 = vmul.f32 %v364_v4, %v319_v42  ;;  %v462_v42 = vmul.f32 %v440_v12, %v1103_v62  ;;  %v479_v62 = vadd.f32 %v463_v20, %v407_v43 }
  0xb3   :  { %v470_v35 = vadd.f32 %v454_v25, %v398_v48  ;;  %v471_v1 = vadd.f32 %v455_v44, %v399_v8  ;;  %v476_v48 = vadd.f32 %v460_v17, %v404_v30 }
  0xb5   :  { %v484_v2 = vadd.f32 %v470_v35, %v468_v14  ;;  %v491_v61 = vadd.f32 %v471_v1, %v469_v7  ;;  %v445_v19 = vpop.permute.xlu1 %444  ;;  %v536_v7 = vld [vmem:[%s1147_s3] sm:$0xff] }
  0xb6   :  { %v464_v44 = vmul.f32 %v445_v19, %v1109_v29  ;;  %v465_v45 = vmul.f32 %v445_v19, %v1111_v0 }
  0xb7   :  { %v485_v60 = vadd.f32 %v484_v2, %v472_v5  ;;  %v492_v37 = vadd.f32 %v491_v61, %v473_v3 }
  0xb9   :  { %v394_v25 = vpop.permute.xlu2 %393 }
  0xba   :  { %v410_v12 = vmul.f32 %v394_v25, %v330_v16  ;;  %v411_v10 = vmul.f32 %v394_v25, %v331_v6 }
  0xc5   :  { %v374_v59 = vpop.permute.xlu0 %373 }
  0xc6   :  { %v402_v24 = vmul.f32 %v374_v59, %v322_v26  ;;  %v403_v18 = vmul.f32 %v374_v59, %v323_v50  ;;  %v478_v50 = vadd.f32 %v462_v42, %v406_v34 }
  0xc8   :  { %v474_v23 = vadd.f32 %v458_v55, %v402_v24  ;;  %v475_v51 = vadd.f32 %v459_v57, %v403_v18 }
  0xca   :  { %v486_v4 = vadd.f32 %v485_v60, %v474_v23  ;;  %v493_v41 = vadd.f32 %v492_v37, %v475_v51 }
  0xcc   :  { %v487_v46 = vadd.f32 %v486_v4, %v476_v48  ;;  %v494_v26 = vadd.f32 %v493_v41, %v477_v11 }
  0xcd   :  { %v389_v13 = vpop.permute.xlu0 %388 }
  0xce   :  { %v408_v33 = vmul.f32 %v389_v13, %v328_v22  ;;  %v409_v8 = vmul.f32 %v389_v13, %v329_v49  ;;  %v488_v15 = vadd.f32 %v487_v46, %v478_v50  ;;  %v495_v47 = vadd.f32 %v494_v26, %v479_v62 }
  0xd0   :  { %v480_v56 = vadd.f32 %v464_v44, %v408_v33  ;;  %v481_v52 = vadd.f32 %v465_v45, %v409_v8 }
  0xd2   :  { %v489_v63 = vadd.f32 %v488_v15, %v480_v56  ;;  %v496_v59 = vadd.f32 %v495_v47, %v481_v52 }
  0xd5   :  { %v450_v35 = vpop.permute.xlu0 %449 }
  0xd6   :  { %v466_v1 = vmul.f32 %v450_v35, %v1115_v38  ;;  %v467_v54 = vmul.f32 %v450_v35, %v1117_v39  ;;  %v542_v38 = vpop.permute.xlu1 %541 }
  0xd8   :  { %v482_v58 = vadd.f32 %v466_v1, %v410_v12  ;;  %v483_v29 = vadd.f32 %v467_v54, %v411_v10 }
  0xda   :  { %v490_v0 = vadd.f32 %v489_v63, %v482_v58  ;;  %v497_v14 = vadd.f32 %v496_v59, %v483_v29 }
  0xdc   :  { %563 = vmatpush.msra.mxu0 %v490_v0  ;;  %583 = vmatpush.msra.mxu1 %v497_v14 }
  0xdd   :  { %598 = vmatmul.msk.f32.vlgmr.msra.gmra.mxu0 %vm544_vm15, %v536_v7  ;;  %599 = vmatmul.msk.f32.vlgmr.msra.gmra.mxu1 %vm544_vm15, %v536_v7 }
 0x15a   :  { %v565_v24 = vpop.f32.mrf.mxu0  ;;  %v585_v39 = vpop.f32.mrf.mxu1 }
 0x15b   :  { %v566_v18 = vadd.f32 %v565_v24, %v542_v38  ;;  %v586_v53 = vadd.f32 %v585_v39, %v542_v38 }
 0x15d   :  { %v588_v55 = vadd.f32 %v566_v18, %v1120_v27  ;;  %v589_v57 = vadd.f32 %v586_v53, %v1123_v40 }
 0x15f   :  { %590 = vst [vmem:[%s1149_s5] sm:$0xff] %v588_v55 }
 0x160   :  { %591 = vst [vmem:[%s1149_s5 + $0x8] sm:$0xff] %v589_v57 }
 0x161   :  { %596 = vsyncpa [#allocation3], 1 }
 0x162   :  { %597 = vsyncpa [#allocation5], 1 }

</bundles_post_ra>
